<compile_context>
chip_gen: v6e
topology: v6e:2x2x1
jax: 0.10.0
libtpu: 0.0.40
codegen_flags: <defaults>
</compile_context>

<pallas_src>
import jax
import jax.numpy as jnp
from jax.experimental import pallas as pl
from jax.experimental.pallas import tpu as pltpu

_TARGET_BLOCK_BYTES = 4 << 20   # ~4 MiB per block; in+out double-buffered ~16 MiB
_VMEM_LIMIT_BYTES = 48 << 20    # > v5e's 16 MiB default scope, < v7x's 64 MiB physical


def _h_swish_kernel(x_ref, o_ref):
    x = x_ref[...]
    # h_sigmoid(x) = ReLU6(x + 3) / 6 ; h_swish(x) = x * h_sigmoid(x)
    o_ref[...] = (x * (jnp.clip(x + 3.0, 0.0, 6.0) / 6.0)).astype(o_ref.dtype)


def _round_up(n: int, m: int) -> int:
    return ((n + m - 1) // m) * m


def h_swish(x: jax.Array, *, donate_input: bool = False) -> jax.Array:
    """Elementwise h_swish matching the PyTorch module (any rank / NCHW)."""
    orig_shape = x.shape
    dtype = x.dtype
    if not jnp.issubdtype(dtype, jnp.floating):
        raise TypeError(f"h_swish expects a floating dtype, got {dtype}")
    if x.size == 0:
        return x

    total = x.size
    itemsize = jnp.dtype(dtype).itemsize
    pack = max(1, 4 // itemsize)      # elements packed per 32-bit word
    sub = 8 * pack                    # native sublane tile rows for this dtype

    # Lane width: prefer a wide lane-dense slab (512); shrink toward 128 for
    # small tensors so we still get >= 2*sub rows -> >=2 grid steps (pipelining
    # + a 2-way split across v7x's TensorCores).
    lane = 128
    for cand in (512, 256, 128):
        if pl.cdiv(total, cand) >= 2 * sub:
            lane = cand
            break

    rows = max(pl.cdiv(total, lane), sub)     # at least one native sublane tile
    padded_total = rows * lane
    pad = padded_total - total                # <= lane-1 except for tiny inputs

    flat = x.reshape(-1)
    if pad:
        flat = jnp.pad(flat, (0, pad))        # h_swish(0) = 0, zero-pad is safe
    x2d = flat.reshape(rows, lane)

    # Block rows: multiple of the packed sublane tile, never larger than the
    # data (so no wasted DMA/VPU work), capped at ~_TARGET_BLOCK_BYTES.
    max_block_rows = max(sub, (_TARGET_BLOCK_BYTES // (lane * itemsize)) // sub * sub)
    block_rows = min(max_block_rows, _round_up(pl.cdiv(rows, 2), sub))
    block_rows = max(block_rows, sub)
    num_tiles = pl.cdiv(rows, block_rows)
    # Prefer an even tile count so the "parallel" axis splits evenly across
    # v7x's two TensorCores (neutral on v5e/v6e).
    if num_tiles > 1 and num_tiles % 2 == 1:
        alt = _round_up(pl.cdiv(rows, num_tiles + 1), sub)
        if alt >= sub:
            block_rows = alt
            num_tiles = pl.cdiv(rows, block_rows)

    out2d = pl.pallas_call(
        _h_swish_kernel,
        out_shape=jax.ShapeDtypeStruct((rows, lane), dtype),
        grid=(num_tiles,),
        in_specs=[pl.BlockSpec((block_rows, lane), lambda i: (i, 0))],
        out_specs=pl.BlockSpec((block_rows, lane), lambda i: (i, 0)),
        compiler_params=pltpu.CompilerParams(
            dimension_semantics=("parallel",),
            vmem_limit_bytes=_VMEM_LIMIT_BYTES,
        ),
        cost_estimate=pl.CostEstimate(
            flops=5 * padded_total,
            transcendentals=0,
            bytes_accessed=2 * padded_total * itemsize,
        ),
        input_output_aliases=({0: 0} if donate_input else {}),
    )(x2d)

    out_flat = out2d.reshape(-1)
    if pad:
        out_flat = out_flat[:total]
    return out_flat.reshape(orig_shape)


def _h_swish_ref(x):
    return x * jnp.clip(x + 3.0, 0.0, 6.0) / 6.0


if __name__ == "__main__":
    key = jax.random.PRNGKey(0)

    # Primary test: small NCHW input (exact multiple of the lane width -> no pad,
    # 2 grid tiles, pipelined).
    x = jax.random.normal(key, (2, 4, 16, 16), dtype=jnp.float32) * 4.0
    y = jax.block_until_ready(h_swish(x))
    assert y.shape == x.shape and y.dtype == x.dtype
    assert jnp.allclose(y, _h_swish_ref(x), atol=1e-6, rtol=1e-6)

    # Ragged-size test: exercises the small lane-pad + final slice path.
    x2 = jax.random.normal(jax.random.PRNGKey(1), (3, 5, 9, 11), dtype=jnp.float32) * 4.0
    y2 = jax.block_until_ready(h_swish(x2))
    assert y2.shape == x2.shape and y2.dtype == x2.dtype
    assert jnp.allclose(y2, _h_swish_ref(x2), atol=1e-6, rtol=1e-6)

    # Wider-slab test: lane=512, row count not a multiple of block rows
    # (exercises the ragged last block with no input padding at all).
    x3 = jax.random.normal(jax.random.PRNGKey(2), (2, 32, 28, 28), dtype=jnp.float32) * 4.0
    y3 = jax.block_until_ready(h_swish(x3))
    assert y3.shape == x3.shape and y3.dtype == x3.dtype
    assert jnp.allclose(y3, _h_swish_ref(x3), atol=1e-6, rtol=1e-6)

    # bf16 test: block rows snap to the 16-row packed sublane tile.
    x4 = (jax.random.normal(jax.random.PRNGKey(3), (2, 32, 28, 28), dtype=jnp.float32) * 4.0
          ).astype(jnp.bfloat16)
    y4 = jax.block_until_ready(h_swish(x4))
    assert y4.shape == x4.shape and y4.dtype == x4.dtype
    ref4 = _h_swish_ref(x4.astype(jnp.float32))
    assert jnp.allclose(y4.astype(jnp.float32), ref4, atol=0.25, rtol=0.05)

    print("KERNEL_OK")
</pallas_src>

<mosaic_0001>
module attributes {stable_mosaic.version = 11 : i64} {
  func.func @_h_swish_kernel(%arg0: i32, %arg1: memref<8x128xf32, #tpu.memory_space<vmem>>, %arg2: memref<8x128xf32, #tpu.memory_space<vmem>>) attributes {dimension_semantics = [#tpu.dimension_semantics<parallel>], iteration_bounds = array<i64: 2>, scalar_prefetch = 0 : i64, scratch_operands = 0 : i64, tpu.core_type = #tpu.core_type<tc>, window_params = [{transform_indices = @transform_0, window_bounds = array<i64: 8, 128>}, {transform_indices = @transform_1, window_bounds = array<i64: 8, 128>}]} {
    %c0 = arith.constant 0 : index
    %c0_0 = arith.constant 0 : index
    %0 = vector.load %arg1[%c0, %c0_0] : memref<8x128xf32, #tpu.memory_space<vmem>>, vector<8x128xf32>
    %cst = arith.constant 3.000000e+00 : f32
    %1 = vector.broadcast %cst : f32 to vector<8x128xf32>
    %2 = arith.addf %0, %1 : vector<8x128xf32>
    %cst_1 = arith.constant 0.000000e+00 : f32
    %cst_2 = arith.constant 6.000000e+00 : f32
    %3 = vector.broadcast %cst_1 : f32 to vector<8x128xf32>
    %4 = arith.maximumf %3, %2 : vector<8x128xf32>
    %5 = vector.broadcast %cst_2 : f32 to vector<8x128xf32>
    %6 = arith.minimumf %5, %4 : vector<8x128xf32>
    %cst_3 = arith.constant 6.000000e+00 : f32
    %7 = vector.broadcast %cst_3 : f32 to vector<8x128xf32>
    %8 = arith.divf %6, %7 : vector<8x128xf32>
    %9 = arith.mulf %0, %8 : vector<8x128xf32>
    %c0_4 = arith.constant 0 : index
    %c0_5 = arith.constant 0 : index
    %10 = vector.load %arg2[%c0_4, %c0_5] : memref<8x128xf32, #tpu.memory_space<vmem>>, vector<8x128xf32>
    tpu.vector_store %arg2[%c0_4, %c0_5], %9 {strides = array<i32>} : memref<8x128xf32, #tpu.memory_space<vmem>>, vector<8x128xf32>,
    return
  }
  func.func @transform_0(%arg0: i32) -> (i32, i32) {
    %c0_i32 = arith.constant 0 : i32
    %c0_i32_0 = arith.constant 0 : i32
    return %arg0, %c0_i32 : i32, i32
  }
  func.func @transform_1(%arg0: i32) -> (i32, i32) {
    %c0_i32 = arith.constant 0 : i32
    %c0_i32_0 = arith.constant 0 : i32
    return %arg0, %c0_i32 : i32, i32
  }
}

</mosaic_0001>

<bundles_post_ra>
// kernel: tpu_custom_call.1
= control target key start
LH: loop header
LB: loop body
LE: loop exit
PB: predicated region body
PF: predicated region fallthrough
CT: control target
= control target key end

     0   :  { %6 = vsyncpa [#allocation3], 0  ;;  %s529_s0 = inlined_call_operand.hbm [shape: f32[16,128], index: 0, kind: input, shape index: {}]   ;;  %s530_s1 = inlined_call_operand.hbm [shape: f32[16,128], index: 1, kind: output, shape index: {}]  }
   0x1   :  { %8 = vsyncpa [#allocation3 + $0x1], 0 }
   0x2   :  { %9 = vsyncpa [#allocation4], 0 }
   0x3   :  { %11 = vsyncpa [#allocation4 + $0x1], 0  ;;  %s388_s6 = smov 0   ;;  %s390_s7 = smov 0  }
   0x4   :  { %s392_s8 = smov 0   ;;  %s394_s9 = smov 0  }
   0x5 LB: > { %s409_s10 = sadd.s32 4294967295, %s374_s9   ;;  %s224_s11 = sadd.s32 4294967294, %s374_s9   ;;  %s374_s9 = sphi %s394_s9, %s547_s9   ;;  %s370_s8 = sphi %s392_s8, %s546_s8   ;;  %s366_s7 = sphi %s390_s7, %s545_s7   ;;  %s362_s6 = sphi %s388_s6, %s544_s6  }
   0x6   : > { %s413_s12 = sadd.s32 1, %s374_s9   ;;  %s24_s13 = sadd.s32 1, %s370_s8 }
   0x7   : > { %s21_s14 = ssub.s32 %s374_s9, %s413_s12  ;;  %p31_p0 = scmp.ne.s32.totalorder %s370_s8, %s366_s7 }
   0x8   : > { %p22_p1 = scmp.eq.s32.totalorder %s21_s14, 0  ;;  %p32_p2 = scmp.eq.s32.totalorder %s374_s9, 0 }
   0x9   : > { %p37_p3 = scmp.ne.s32.totalorder %s366_s7, %s362_s6  ;;  %p38_p4 = scmp.eq.s32.totalorder %s409_s10, 0 }
   0xa   : > { %s425_s15 = scalar_select %p22_p1, %s370_s8, %s24_s13  }
   0xb   : > { %p427_p5 = por %p32_p2, %p31_p0  ;;  %p431_p6 = por %p38_p4, %p37_p3 }
   0xc   : > { %p61_p7 = scmp.eq.s32.totalorder %s409_s10, 1  ;;  %p67_p8 = scmp.eq.s32.totalorder %s224_s11, 1 }
   0xd   : > { %s534_s17 = scalar_select %p431_p6, 1, 0 }
   0xe   : > { %p248_p10 = scmp.lt.s32.totalorder %s374_s9, 2  ;;  %p438_p11 = por %p61_p7, %p31_p0 }
   0xf   : > { %p442_p12 = por %p67_p8, %p37_p3  ;;  %s87_s20 = sand.u32 1, %s370_s8  }
  0x10   : > { %s535_s18 = scalar_select %p438_p11, 1, 0 }
  0x11   : > { %s536_s19 = scalar_select %p442_p12, 1, 0 }
  0x12   : > { %s228_s21 = sshll.u32 %s374_s9, 7  ;;  %s227_s22 = sshll.u32 %s87_s20, 3 }
  0x13   : > { %s451_s25 = scalar_lea.hbm %s529_s0, %s228_s21  ;;  %s91_s26 = scalar_lea.vmem [#allocation2], %s227_s22 }
  0x14   : > { %s98_s27 = sshll.u32 %s91_s26, 4  ;;  %p455_p13 = pnand %p248_p10, %p427_p5  ;;  %s459_s27 = int_to_ptr.vmem [resolvable:$true] %s98_s27 }
  0x15   : > { %s88_s29 = scalar_lea.sflag [#allocation3], %s87_s20  ;;  %s282_s30 = scalar_lea.hbm %s451_s25, 128 }
  0x16   : > { %p283_p2 = scmp.ne.s32.totalorder %s451_s25, %s282_s30  ;;  %p284_p3 = pneg %p455_p13 }
  0x17   : > { %s287_s4 = scalar_lea.hbm %s529_s0, 256  ;;  %p288_p5 = scmp.lt.s32.totalorder %s451_s25, %s529_s0 }
  0x18   : > { %p285_p4 = pnand %p284_p3, %p283_p2  ;;  %p289_p8 = scmp.lt.s32.totalorder %s287_s4, %s282_s30 }
  0x1a   : > { %p286_p7 = pneg %p285_p4  ;;  %p290_p10 = por %p289_p8, %p288_p5 }
  0x1c   : > { %p291_p9 = pnand %p290_p10, %p286_p7 }
  0x1e   : > { %294 = shalt.err (!%p291_p9)
}
  0x1f   : > { %s295_s13 = scalar_lea.vmem %s459_s27, 128  ;;  %s376_s14 = smov [#allocation2]  }
  0x20   : > { %p296_p0 = scmp.ne.s32.totalorder %s459_s27, %s295_s13  ;;  %s300_s16 = sshll.u32 %s376_s14, 4  ;;  %s301_s16 = int_to_ptr.vmem [resolvable:$false] %s300_s16 }
  0x21   : > { %s302_s20 = scalar_lea.vmem %s301_s16, 256  ;;  %p303_p4 = scmp.lt.s32.totalorder %s459_s27, %s301_s16 }
  0x22   : > { %p298_p1 = pnand %p296_p0, %p284_p3  ;;  %p304_p12 = scmp.lt.s32.totalorder %s302_s20, %s295_s13 }
  0x24   : > { %p299_p2 = pneg %p298_p1  ;;  %p305_p11 = por %p304_p12, %p303_p4 }
  0x26   : > { %p306_p6 = pnand %p305_p11, %p299_p2 }
  0x28   : > { %309 = shalt.err (!%p306_p6)
}
  0x29   : > { %243 = dma.hbm_to_vmem [thread:$0]  (!%p455_p13), %s451_s25, 128, %s459_s27, %s88_s29  }
  0x2a   : > { %p538_p9 = scmp.lt.s32.totalorder %s374_s9, 3  ;;  %p539_p7 = scmp.ge.s32.totalorder %s374_s9, 1 }
  0x2c   : > { %p104_p0 = pnand %p539_p7, %p538_p9 }
  0x2d   : > { %s486_s21 = sand.u32 (!%p104_p0), 1, %s366_s7   ;;  %p540_p6 = scmp.ne.s32.totalorder (!%p104_p0), %s534_s17, 0 }
  0x2e   : > { %107 = sbr.rel (%p104_p0) target bundleno = 77 (0x4d), region = 24  ;;  %s230_s22 = sshll.u32 (!%p104_p0), %s486_s21, 3 }
  0x2f   : > { %s110_s23 = scalar_lea.sflag (!%p104_p0), [#allocation3], %s486_s21  ;;  %s113_s24 = scalar_lea.vmem (!%p104_p0), [#allocation2], %s230_s22 }
  0x33   : > { %353 = dma.done.wait (%p540_p6), %s110_s23, 128  }
  0x34   : > { %355 = vsyncadd (%p540_p6), %s110_s23, 4294967168  ;;  %v132_v0 = vld [vmem:[%s113_s24] sm:$0xff]  ;;  %s131_s25 = scalar_lea.vmem [#allocation5], %s230_s22  ;;  %s233_s27 = sshll.u32 %s409_s10, 7 }
  0x35   : > { %v133_v1 = vadd.f32 3.0, %v132_v0  ;;  %s154_s26 = sshll.u32 %s131_s25, 4  ;;  %s152_s30 = scalar_lea.hbm %s530_s1, %s233_s27  ;;  %s155_s26 = int_to_ptr.vmem [resolvable:$true] %s154_s26 }
  0x36   : > { %s141_s17 = scalar_lea.sflag [#allocation4], %s486_s21  ;;  %s310_s2 = scalar_lea.vmem %s155_s26, 128 }
  0x37   : > { %v134_v2 = vmax.f32 %v133_v1, 0.0  ;;  %p311_p11 = scmp.ne.s32.totalorder %s155_s26, %s310_s2  ;;  %p541_p12 = scmp.ne.s32.totalorder %s535_s18, 0 }
  0x38   : > { %s377_s3 = smov [#allocation5]  }
  0x39   : > { %v135_v3 = vmin.f32 %v134_v2, 6.0  ;;  %p312_p13 = pnand %p311_p11, %p541_p12  ;;  %s314_s4 = sshll.u32 %s377_s3, 4  ;;  %s315_s4 = int_to_ptr.vmem [resolvable:$false] %s314_s4 }
  0x3a   : > { %s316_s5 = scalar_lea.vmem %s315_s4, 256  ;;  %p317_p3 = scmp.lt.s32.totalorder %s155_s26, %s315_s4 }
  0x3b   : > { %v137_v4 = vmul.f32 0.16666667, %v135_v3  ;;  %p313_p1 = pneg %p312_p13  ;;  %p318_p5 = scmp.lt.s32.totalorder %s316_s5, %s310_s2 }
  0x3d   : > { %v138_v5 = vmul.f32 %v137_v4, %v132_v0  ;;  %p319_p8 = por %p318_p5, %p317_p3 }
  0x3f   : > { %139 = vst [vmem:[%s131_s25] sm:$0xff] %v138_v5  ;;  %p320_p10 = pnand %p319_p8, %p313_p1 }
  0x41   : > { %323 = shalt.err (!%p320_p10)
}
  0x42   : > { %s324_s10 = scalar_lea.hbm %s152_s30, 128  ;;  %s328_s14 = scalar_lea.hbm %s530_s1, 256 }
  0x43   : > { %p325_p2 = scmp.ne.s32.totalorder %s152_s30, %s324_s10  ;;  %p329_p7 = scmp.lt.s32.totalorder %s152_s30, %s530_s1 }
  0x44   : > { %p330_p0 = scmp.lt.s32.totalorder %s328_s14, %s324_s10 }
  0x45   : > { %p326_p4 = pnand %p325_p2, %p541_p12 }
  0x46   : > { %p331_p6 = por %p330_p0, %p329_p7 }
  0x47   : > { %p327_p9 = pneg %p326_p4 }
  0x49   : > { %p332_p11 = pnand %p331_p6, %p327_p9 }
  0x4b   : > { %335 = shalt.err (!%p332_p11)
}
  0x4c   : > { %238 = dma.vmem_to_hbm [thread:$0]  (%p541_p12), %s155_s26, 128, %s152_s30, %s141_s17  }
  0x4d PF: > { %s166_s21 = sand.u32 1, %s362_s6   ;;  %p542_p13 = scmp.ne.s32.totalorder %s536_s19, 0 }
  0x4e   : > { %p543_p1 = scmp.ge.s32.totalorder %s374_s9, 2  ;;  %s167_s22 = scalar_lea.sflag [#allocation4], %s166_s21 }
  0x50   : > { %p245_p3 = pnand %p543_p1, %p542_p13 }
  0x52   : > { %p246_p5 = pneg %p245_p3 }
  0x54   : > { %357 = dma.done.wait (%p246_p5), %s167_s22, 128  }
  0x55   : > { %359 = vsyncadd (%p246_p5), %s167_s22, 4294967168  ;;  %p14_p8 = scmp.ge.s32.totalorder %s413_s12, 4   ;;  %s544_s6 = smov %s366_s7 }
  0x56   : > { %s545_s7 = smov %s370_s8  ;;  %s546_s8 = smov %s425_s15 }
  0x57   : > { %s547_s9 = smov %s413_s12  ;;  %16 = sbr.rel (!%p14_p8) target bundleno = 5 (0x5), region = 69 }
  0x5c   :  { %172 = vsyncpa [#allocation3], 1 }
  0x5d   :  { %174 = vsyncpa [#allocation3 + $0x1], 1 }
  0x5e   :  { %175 = vsyncpa [#allocation4], 1 }
  0x5f   :  { %177 = vsyncpa [#allocation4 + $0x1], 1 }

</bundles_post_ra>
